<compile_context>
chip_gen: v7x
topology: tpu7x:2x2x1
jax: 0.10.0
libtpu: 0.0.40
codegen_flags: <defaults>
</compile_context>

<pallas_src>
from functools import partial

import jax
import jax.numpy as jnp
from jax.experimental import pallas as pl
from jax.experimental.pallas import tpu as pltpu

EPS = 1e-9            # matches the 1e-09 used by the PyTorch module
_PART_ROWS = 8        # sublane-aligned rows per partial-loss block
_LANES = 128


def _corr_kernel(idx_ref, ow_ref, os_ref, conf_hbm, part_ref, *rest,
                 block_b, update_target):
    if update_target:
        newtgt_ref, tgt_buf, sem = rest
    else:
        tgt_buf, sem = rest
        newtgt_ref = None

    i = pl.program_id(0)

    # -- 1) kick off the fused gather: confidence[index[i*bb + r], :] -> tgt_buf[r]
    @pl.loop(0, block_b)
    def _issue(r):
        row = idx_ref[i * block_b + r]
        pltpu.make_async_copy(conf_hbm.at[row], tgt_buf.at[r], sem.at[0]).start()

    # -- 2) softmax / log-softmax while the gather DMAs are in flight (f32).
    def softmax_logsoftmax(x):
        m = jnp.max(x, axis=1, keepdims=True)
        z = x - m
        e = jnp.exp(z)
        s = jnp.sum(e, axis=1, keepdims=True)
        # exact per-row reciprocal (keeps the 1e-5/1e-6 test tolerances)
        return e * pl.reciprocal(s), z - jnp.log(s)

    pw, lw = softmax_logsoftmax(ow_ref[...].astype(jnp.float32))
    ps, ls = softmax_logsoftmax(os_ref[...].astype(jnp.float32))

    # -- 3) wait for the gathered target rows (matched per-row descriptors).
    @pl.loop(0, block_b)
    def _wait(r):
        pltpu.make_async_copy(conf_hbm.at[0], tgt_buf.at[r], sem.at[0]).wait()

    tgt = tgt_buf[...].astype(jnp.float32)
    # target rows are non-negative probability rows -> "neg" (t == 0) is ~pos.
    pos = tgt > 0.0

    # -- 4) loss: one merged per-element log feeds both terms
    #    sup (t == 0): -log((|1-pw|+eps)*(|1-ps|+eps))
    #    kl  (t  > 0): t*(2*log(t) - lw - ls)     [batchmean /B in the wrapper]
    prod = (jnp.abs(1.0 - pw) + EPS) * (jnp.abs(1.0 - ps) + EPS)
    L = jnp.log(jnp.where(pos, tgt, prod))
    elem = jnp.where(pos, tgt * (2.0 * L - lw - ls), -L)

    # single fused reduction (lane reduce, then sublane reduce)
    # TODO(synk): if profiling shows XLU binding, push these row sums onto the
    # idle MXU via jnp.dot(elem, ones((C, 128))).
    part = jnp.sum(jnp.sum(elem, axis=1, keepdims=True), axis=0, keepdims=True)
    part_ref[...] = jnp.broadcast_to(part, part_ref.shape)

    # -- 5) target update: r = 1[t>0] * sqrt(ps*pw), row-normalized.
    if update_target:
        r = jnp.where(pos, jnp.sqrt(ps * pw), 0.0)
        inv = pl.reciprocal(jnp.sum(r, axis=1, keepdims=True) + EPS)
        newtgt_ref[...] = (r * inv).astype(newtgt_ref.dtype)


def _vmem_budget_and_limit():
    """Generation-aware VMEM budget (block sizing) + Mosaic scoped limit."""
    try:
        cap = pltpu.get_tpu_info().vmem_capacity_bytes  # 128 MiB v5e/v6e, 64 MiB v7x
    except Exception:                                   # interpret mode / API drift
        cap = 64 * 1024 * 1024
    return int(cap * 0.40), int(cap * 0.70)


def _pick_block_b(B, C, in_itemsize, conf_itemsize, budget_bytes, update_target):
    """Largest batch-block that divides B, respects the sublane rule
    (multiple of 8 or == B), fits the VMEM budget and leaves >= 2 grid blocks
    (both v7x TensorCores) whenever possible."""
    per_row = C * (
        2 * 2 * in_itemsize                              # ow, os double-buffered blocks
        + (2 * conf_itemsize if update_target else 0)    # new-target out block (x2)
        + conf_itemsize                                  # gather scratch
        + 6 * 4)                                         # ~6 live f32 temporaries
    cap = max(1, budget_bytes // max(per_row, 1))
    cap = min(cap, B, 4096)
    if B >= 16:
        cap = min(cap, B // 2)                           # keep grid >= 2 (v7x)
    cands = [d for d in range(1, cap + 1)
             if B % d == 0 and (d % 8 == 0 or d == B)]
    if cands:
        return max(cands)
    # Fallbacks that still satisfy the sublane rule (never a misaligned block).
    return 8 if B % 8 == 0 else B


def corr_loss_pallas(output_w, output_s, confidence, index, *,
                     update_target=True, block_b=None, vmem_budget_bytes=None):
    """Fused CORR loss.  Gathers confidence[index] inside the kernel.
    Returns (loss, new_target[B, C]) when update_target, else just loss."""
    B, C = output_w.shape
    assert output_s.shape == (B, C)
    N, C2 = confidence.shape
    assert C2 == C and index.shape == (B,)

    budget, vmem_limit = _vmem_budget_and_limit()
    if vmem_budget_bytes is not None:
        budget = vmem_budget_bytes
    if block_b is None:
        block_b = _pick_block_b(B, C, jnp.dtype(output_w.dtype).itemsize,
                                jnp.dtype(confidence.dtype).itemsize,
                                budget, update_target)
    if B % block_b != 0 or not (block_b % 8 == 0 or block_b == B):
        raise ValueError(f"block_b={block_b} must divide B={B} and be a "
                         "multiple of 8 (or the full batch)")
    grid_b = B // block_b
    index = index.astype(jnp.int32)

    kernel = partial(_corr_kernel, block_b=block_b, update_target=update_target)
    in_specs = [pl.BlockSpec((block_b, C), lambda i, idx: (i, 0)),   # output_w
                pl.BlockSpec((block_b, C), lambda i, idx: (i, 0)),   # output_s
                pl.BlockSpec(memory_space=pl.ANY)]                   # confidence (HBM)
    part_shape = jax.ShapeDtypeStruct((grid_b * _PART_ROWS, _LANES), jnp.float32)
    part_spec = pl.BlockSpec((_PART_ROWS, _LANES), lambda i, idx: (i, 0))
    scratch = [pltpu.VMEM((block_b, C), confidence.dtype),   # gathered target rows
               pltpu.SemaphoreType.DMA((1,))]

    if update_target:
        out_shape = (part_shape, jax.ShapeDtypeStruct((B, C), confidence.dtype))
        out_specs = (part_spec, pl.BlockSpec((block_b, C), lambda i, idx: (i, 0)))
    else:
        out_shape = part_shape
        out_specs = part_spec

    res = pl.pallas_call(
        kernel,
        out_shape=out_shape,
        grid_spec=pltpu.PrefetchScalarGridSpec(
            num_scalar_prefetch=1,
            grid=(grid_b,),
            in_specs=in_specs,
            out_specs=out_specs,
            scratch_shapes=scratch),
        compiler_params=pltpu.CompilerParams(
            dimension_semantics=("parallel",),
            vmem_limit_bytes=vmem_limit),
    )(index, output_w, output_s, confidence)

    partials = res[0] if update_target else res
    # each block broadcast-fills its (8,128) slab with the same partial value
    loss = jnp.sum(partials) / (_PART_ROWS * _LANES * B)
    if update_target:
        return loss, res[1]
    return loss


def corr_loss_forward(confidence, output_w, output_s, index,
                      update_target=True, block_b=None):
    """Functional equivalent of CORR_loss.forward; returns (loss, confidence)."""
    if not update_target:
        loss = corr_loss_pallas(output_w, output_s, confidence, index,
                                update_target=False, block_b=block_b)
        return loss, confidence
    loss, new_target = corr_loss_pallas(output_w, output_s, confidence, index,
                                        update_target=True, block_b=block_b)
    # TODO(synk): fold this scatter into the kernel (input_output_aliases on
    # `confidence` + per-row DMA write-back) to drop the XLA scatter pass too.
    confidence = confidence.at[index, :].set(new_target)
    return loss, confidence


def _reference_forward(confidence, ow, osq, index, update_target=True):
    """Pure-JAX reference mirroring the PyTorch module."""
    target = confidence[index, :]
    B = ow.shape[0]
    pw = jax.nn.softmax(ow.astype(jnp.float32), axis=1)
    ps = jax.nn.softmax(osq.astype(jnp.float32), axis=1)
    neg = (target == 0).astype(jnp.float32)
    sup = neg * (-jnp.log(jnp.abs(1 - pw) + EPS) - jnp.log(jnp.abs(1 - ps) + EPS))
    sup1 = jnp.sum(sup) / B
    lw = jax.nn.log_softmax(ow.astype(jnp.float32), axis=1)
    ls = jax.nn.log_softmax(osq.astype(jnp.float32), axis=1)
    pos = target > 0
    log_t = jnp.log(jnp.where(pos, target, 1.0))
    kl_w = jnp.sum(jnp.where(pos, target * (log_t - lw), 0.0)) / B
    kl_s = jnp.sum(jnp.where(pos, target * (log_t - ls), 0.0)) / B
    loss = sup1 + kl_w + kl_s
    if not update_target:
        return loss, confidence
    rY = pos.astype(jnp.float32)
    r = jnp.sqrt((rY * ps) * (rY * pw))
    r = r / (jnp.sum(r, axis=1, keepdims=True) + EPS)
    return loss, confidence.at[index, :].set(r.astype(confidence.dtype))


if __name__ == "__main__":
    N, B, C = 32, 16, 16
    key = jax.random.PRNGKey(0)
    k_mask, k_perm, k_w, k_s = jax.random.split(key, 4)

    # Deterministic partial-label "confidence" matrix: candidate mask with a
    # guaranteed positive per row, rows normalized to sum to 1.
    mask = (jax.random.uniform(k_mask, (N, C)) < 0.4).astype(jnp.float32)
    mask = mask.at[jnp.arange(N), jnp.arange(N) % C].set(1.0)
    confidence = mask / jnp.sum(mask, axis=1, keepdims=True)

    index = jax.random.permutation(k_perm, N)[:B]
    output_w = jax.random.normal(k_w, (B, C), dtype=jnp.float32)
    output_s = jax.random.normal(k_s, (B, C), dtype=jnp.float32)

    ref_loss, ref_conf = _reference_forward(confidence, output_w, output_s, index)

    # Explicit multi-block grid (exercises the fused gather + per-block partials).
    loss, new_conf = corr_loss_forward(confidence, output_w, output_s, index,
                                       update_target=True, block_b=8)
    loss = jax.block_until_ready(loss)
    new_conf = jax.block_until_ready(new_conf)
    assert jnp.allclose(loss, ref_loss, rtol=1e-5, atol=1e-5), (loss, ref_loss)
    assert jnp.allclose(new_conf, ref_conf, rtol=1e-5, atol=1e-6)

    # Auto block sizing path (generation-aware VMEM budget).
    loss2, new_conf2 = corr_loss_forward(confidence, output_w, output_s, index,
                                         update_target=True, block_b=None)
    loss2 = jax.block_until_ready(loss2)
    new_conf2 = jax.block_until_ready(new_conf2)
    assert jnp.allclose(loss2, ref_loss, rtol=1e-5, atol=1e-5), (loss2, ref_loss)
    assert jnp.allclose(new_conf2, ref_conf, rtol=1e-5, atol=1e-6)

    # Loss-only fast path (no new-target output / update math).
    loss3, conf3 = corr_loss_forward(confidence, output_w, output_s, index,
                                     update_target=False)
    loss3 = jax.block_until_ready(loss3)
    assert jnp.allclose(loss3, ref_loss, rtol=1e-5, atol=1e-5), (loss3, ref_loss)
    assert jnp.allclose(conf3, confidence)

    print("KERNEL_OK")
</pallas_src>

<mosaic_0001>
module attributes {stable_mosaic.version = 11 : i64} {
  func.func @_corr_kernel(%arg0: i32, %arg1: memref<16xi32, #tpu.memory_space<smem>>, %arg2: memref<8x16xf32, #tpu.memory_space<vmem>>, %arg3: memref<8x16xf32, #tpu.memory_space<vmem>>, %arg4: memref<32x16xf32, #tpu.memory_space<any>>, %arg5: memref<8x128xf32, #tpu.memory_space<vmem>>, %arg6: memref<8x16xf32, #tpu.memory_space<vmem>>, %arg7: memref<8x16xf32, #tpu.memory_space<vmem>>, %arg8: memref<1x!tpu.dma_semaphore, #tpu.memory_space<semaphore_mem>>) attributes {dimension_semantics = [#tpu.dimension_semantics<parallel>], iteration_bounds = array<i64: 2>, scalar_prefetch = 1 : i64, scratch_operands = 2 : i64, tpu.core_type = #tpu.core_type<tc>, window_params = [{transform_indices = @transform_0, window_bounds = array<i64: 8, 16>}, {transform_indices = @transform_1, window_bounds = array<i64: 8, 16>}, {}, {transform_indices = @transform_3, window_bounds = array<i64: 8, 128>}, {transform_indices = @transform_4, window_bounds = array<i64: 8, 16>}]} {
    %c0_i32 = arith.constant 0 : i32
    %c8_i32 = arith.constant 8 : i32
    %0 = arith.addi %c0_i32, %c8_i32 : i32
    %c1_i32 = arith.constant 1 : i32
    scf.for %arg9 = %c0_i32 to %0 step %c1_i32  : i32 {
      %c1_i32_29 = arith.constant 1 : i32
      %73 = arith.muli %arg9, %c1_i32_29 : i32
      %c0_i32_30 = arith.constant 0 : i32
      %74 = arith.addi %c0_i32_30, %73 : i32
      %c8_i32_31 = arith.constant 8 : i32
      %75 = arith.muli %arg0, %c8_i32_31 : i32
      %76 = arith.addi %75, %74 : i32
      %77 = arith.index_cast %76 : i32 to index
      %78 = memref.load %arg1[%77] : memref<16xi32, #tpu.memory_space<smem>>
      %c0_i32_32 = arith.constant 0 : i32
      %c0_i32_33 = arith.constant 0 : i32
      %79 = tpu.memref_slice %arg4[%78, %c0_i32_33] : memref<32x16xf32, #tpu.memory_space<any>> -> memref<1x16xf32, #tpu.memory_space<any>>
      %80 = tpu.memref_squeeze %79 : memref<1x16xf32, #tpu.memory_space<any>> -> memref<16xf32, #tpu.memory_space<any>>
      %c0_i32_34 = arith.constant 0 : i32
      %81 = tpu.memref_slice %arg7[%74, %c0_i32_34] : memref<8x16xf32, #tpu.memory_space<vmem>> -> memref<1x16xf32, #tpu.memory_space<vmem>>
      %82 = tpu.memref_squeeze %81 : memref<1x16xf32, #tpu.memory_space<vmem>> -> memref<16xf32, #tpu.memory_space<vmem>>
      %83 = tpu.memref_slice %arg8[%c0_i32_32] : memref<1x!tpu.dma_semaphore, #tpu.memory_space<semaphore_mem>> -> memref<1x!tpu.dma_semaphore, #tpu.memory_space<semaphore_mem>>
      %84 = tpu.memref_squeeze %83 : memref<1x!tpu.dma_semaphore, #tpu.memory_space<semaphore_mem>> -> memref<!tpu.dma_semaphore, #tpu.memory_space<semaphore_mem>>
      tpu.enqueue_dma source(%80 : memref<16xf32, #tpu.memory_space<any>>) target(%82 : memref<16xf32, #tpu.memory_space<vmem>>) target_semaphore(%84 : memref<!tpu.dma_semaphore, #tpu.memory_space<semaphore_mem>>)
    }
    %c8_i32_0 = arith.constant 8 : i32
    %c0 = arith.constant 0 : index
    %c0_1 = arith.constant 0 : index
    %1 = vector.load %arg2[%c0, %c0_1] : memref<8x16xf32, #tpu.memory_space<vmem>>, vector<8x16xf32>
    %cst = arith.constant dense<0xFF800000> : vector<8xf32>
    %2 = vector.multi_reduction <maximumf>, %1, %cst [1] : vector<8x16xf32> to vector<8xf32>
    %3 = vector.shape_cast %2 : vector<8xf32> to vector<8x1xf32>
    %4 = vector.broadcast %3 : vector<8x1xf32> to vector<8x16xf32>
    %5 = arith.subf %1, %4 : vector<8x16xf32>
    %6 = math.exp %5 : vector<8x16xf32>
    %cst_2 = arith.constant dense<0.000000e+00> : vector<8xf32>
    %7 = vector.multi_reduction <add>, %6, %cst_2 [1] : vector<8x16xf32> to vector<8xf32>
    %8 = vector.shape_cast %7 : vector<8xf32> to vector<8x1xf32>
    %9 = tpu.reciprocal %8 : vector<8x1xf32> -> vector<8x1xf32>
    %10 = vector.broadcast %9 : vector<8x1xf32> to vector<8x16xf32>
    %11 = arith.mulf %6, %10 : vector<8x16xf32>
    %12 = math.log %8 : vector<8x1xf32>
    %13 = vector.broadcast %12 : vector<8x1xf32> to vector<8x16xf32>
    %14 = arith.subf %5, %13 : vector<8x16xf32>
    %c0_3 = arith.constant 0 : index
    %c0_4 = arith.constant 0 : index
    %15 = vector.load %arg3[%c0_3, %c0_4] : memref<8x16xf32, #tpu.memory_space<vmem>>, vector<8x16xf32>
    %cst_5 = arith.constant dense<0xFF800000> : vector<8xf32>
    %16 = vector.multi_reduction <maximumf>, %15, %cst_5 [1] : vector<8x16xf32> to vector<8xf32>
    %17 = vector.shape_cast %16 : vector<8xf32> to vector<8x1xf32>
    %18 = vector.broadcast %17 : vector<8x1xf32> to vector<8x16xf32>
    %19 = arith.subf %15, %18 : vector<8x16xf32>
    %20 = math.exp %19 : vector<8x16xf32>
    %cst_6 = arith.constant dense<0.000000e+00> : vector<8xf32>
    %21 = vector.multi_reduction <add>, %20, %cst_6 [1] : vector<8x16xf32> to vector<8xf32>
    %22 = vector.shape_cast %21 : vector<8xf32> to vector<8x1xf32>
    %23 = tpu.reciprocal %22 : vector<8x1xf32> -> vector<8x1xf32>
    %24 = vector.broadcast %23 : vector<8x1xf32> to vector<8x16xf32>
    %25 = arith.mulf %20, %24 : vector<8x16xf32>
    %26 = math.log %22 : vector<8x1xf32>
    %27 = vector.broadcast %26 : vector<8x1xf32> to vector<8x16xf32>
    %28 = arith.subf %19, %27 : vector<8x16xf32>
    %c0_i32_7 = arith.constant 0 : i32
    %c8_i32_8 = arith.constant 8 : i32
    %29 = arith.addi %c0_i32_7, %c8_i32_8 : i32
    %c1_i32_9 = arith.constant 1 : i32
    scf.for %arg9 = %c0_i32_7 to %29 step %c1_i32_9  : i32 {
      %c1_i32_29 = arith.constant 1 : i32
      %73 = arith.muli %arg9, %c1_i32_29 : i32
      %c0_i32_30 = arith.constant 0 : i32
      %74 = arith.addi %c0_i32_30, %73 : i32
      %c0_i32_31 = arith.constant 0 : i32
      %c0_i32_32 = arith.constant 0 : i32
      %c0_i32_33 = arith.constant 0 : i32
      %75 = tpu.memref_slice %arg4[%c0_i32_31, %c0_i32_33] : memref<32x16xf32, #tpu.memory_space<any>> -> memref<1x16xf32, #tpu.memory_space<any>>
      %76 = tpu.memref_squeeze %75 : memref<1x16xf32, #tpu.memory_space<any>> -> memref<16xf32, #tpu.memory_space<any>>
      %c0_i32_34 = arith.constant 0 : i32
      %77 = tpu.memref_slice %arg7[%74, %c0_i32_34] : memref<8x16xf32, #tpu.memory_space<vmem>> -> memref<1x16xf32, #tpu.memory_space<vmem>>
      %78 = tpu.memref_squeeze %77 : memref<1x16xf32, #tpu.memory_space<vmem>> -> memref<16xf32, #tpu.memory_space<vmem>>
      %79 = tpu.memref_slice %arg8[%c0_i32_32] : memref<1x!tpu.dma_semaphore, #tpu.memory_space<semaphore_mem>> -> memref<1x!tpu.dma_semaphore, #tpu.memory_space<semaphore_mem>>
      %80 = tpu.memref_squeeze %79 : memref<1x!tpu.dma_semaphore, #tpu.memory_space<semaphore_mem>> -> memref<!tpu.dma_semaphore, #tpu.memory_space<semaphore_mem>>
      tpu.wait_dma2 semaphore(%80 : memref<!tpu.dma_semaphore, #tpu.memory_space<semaphore_mem>>) src(%76 : memref<16xf32, #tpu.memory_space<any>>) dst(%78 : memref<16xf32, #tpu.memory_space<vmem>>)
    }
    %c8_i32_10 = arith.constant 8 : i32
    %c0_11 = arith.constant 0 : index
    %c0_12 = arith.constant 0 : index
    %30 = vector.load %arg7[%c0_11, %c0_12] : memref<8x16xf32, #tpu.memory_space<vmem>>, vector<8x16xf32>
    %cst_13 = arith.constant 0.000000e+00 : f32
    %31 = vector.broadcast %cst_13 : f32 to vector<8x16xf32>
    %32 = arith.cmpf ogt, %30, %31 : vector<8x16xf32>
    %cst_14 = arith.constant 1.000000e+00 : f32
    %33 = vector.broadcast %cst_14 : f32 to vector<8x16xf32>
    %34 = arith.subf %33, %11 : vector<8x16xf32>
    %35 = math.absf %34 : vector<8x16xf32>
    %cst_15 = arith.constant 9.99999971E-10 : f32
    %36 = vector.broadcast %cst_15 : f32 to vector<8x16xf32>
    %37 = arith.addf %35, %36 : vector<8x16xf32>
    %cst_16 = arith.constant 1.000000e+00 : f32
    %38 = vector.broadcast %cst_16 : f32 to vector<8x16xf32>
    %39 = arith.subf %38, %25 : vector<8x16xf32>
    %40 = math.absf %39 : vector<8x16xf32>
    %cst_17 = arith.constant 9.99999971E-10 : f32
    %41 = vector.broadcast %cst_17 : f32 to vector<8x16xf32>
    %42 = arith.addf %40, %41 : vector<8x16xf32>
    %43 = arith.mulf %37, %42 : vector<8x16xf32>
    %44 = arith.select %32, %30, %43 : vector<8x16xi1>, vector<8x16xf32>
    %45 = math.log %44 : vector<8x16xf32>
    %cst_18 = arith.constant 2.000000e+00 : f32
    %46 = vector.broadcast %cst_18 : f32 to vector<8x16xf32>
    %47 = arith.mulf %46, %45 : vector<8x16xf32>
    %48 = arith.subf %47, %14 : vector<8x16xf32>
    %49 = arith.subf %48, %28 : vector<8x16xf32>
    %50 = arith.mulf %30, %49 : vector<8x16xf32>
    %cst_19 = arith.constant 0.000000e+00 : f32
    %51 = vector.broadcast %cst_19 : f32 to vector<8x16xf32>
    %52 = arith.subf %51, %45 : vector<8x16xf32>
    %53 = arith.select %32, %50, %52 : vector<8x16xi1>, vector<8x16xf32>
    %cst_20 = arith.constant dense<0.000000e+00> : vector<8xf32>
    %54 = vector.multi_reduction <add>, %53, %cst_20 [1] : vector<8x16xf32> to vector<8xf32>
    %55 = vector.shape_cast %54 : vector<8xf32> to vector<8x1xf32>
    %cst_21 = arith.constant dense<0.000000e+00> : vector<1xf32>
    %56 = vector.multi_reduction <add>, %55, %cst_21 [0] : vector<8x1xf32> to vector<1xf32>
    %57 = vector.shape_cast %56 : vector<1xf32> to vector<1x1xf32>
    %58 = vector.shape_cast %57 : vector<1x1xf32> to vector<1x1xf32>
    %59 = vector.broadcast %58 : vector<1x1xf32> to vector<8x128xf32>
    %c0_22 = arith.constant 0 : index
    %c0_23 = arith.constant 0 : index
    %60 = vector.load %arg5[%c0_22, %c0_23] : memref<8x128xf32, #tpu.memory_space<vmem>>, vector<8x128xf32>
    tpu.vector_store %arg5[%c0_22, %c0_23], %59 {strides = array<i32>} : memref<8x128xf32, #tpu.memory_space<vmem>>, vector<8x128xf32>,
    %61 = arith.mulf %25, %11 : vector<8x16xf32>
    %62 = math.sqrt %61 : vector<8x16xf32>
    %cst_24 = arith.constant 0.000000e+00 : f32
    %63 = vector.broadcast %cst_24 : f32 to vector<8x16xf32>
    %64 = arith.select %32, %62, %63 : vector<8x16xi1>, vector<8x16xf32>
    %cst_25 = arith.constant dense<0.000000e+00> : vector<8xf32>
    %65 = vector.multi_reduction <add>, %64, %cst_25 [1] : vector<8x16xf32> to vector<8xf32>
    %66 = vector.shape_cast %65 : vector<8xf32> to vector<8x1xf32>
    %cst_26 = arith.constant 9.99999971E-10 : f32
    %67 = vector.broadcast %cst_26 : f32 to vector<8x1xf32>
    %68 = arith.addf %66, %67 : vector<8x1xf32>
    %69 = tpu.reciprocal %68 : vector<8x1xf32> -> vector<8x1xf32>
    %70 = vector.broadcast %69 : vector<8x1xf32> to vector<8x16xf32>
    %71 = arith.mulf %64, %70 : vector<8x16xf32>
    %c0_27 = arith.constant 0 : index
    %c0_28 = arith.constant 0 : index
    %72 = vector.load %arg6[%c0_27, %c0_28] : memref<8x16xf32, #tpu.memory_space<vmem>>, vector<8x16xf32>
    tpu.vector_store %arg6[%c0_27, %c0_28], %71 {strides = array<i32>} : memref<8x16xf32, #tpu.memory_space<vmem>>, vector<8x16xf32>,
    return
  }
  func.func @transform_0(%arg0: i32, %arg1: memref<16xi32, #tpu.memory_space<smem>>) -> (i32, i32) {
    %c0_i32 = arith.constant 0 : i32
    %c0_i32_0 = arith.constant 0 : i32
    return %arg0, %c0_i32 : i32, i32
  }
  func.func @transform_1(%arg0: i32, %arg1: memref<16xi32, #tpu.memory_space<smem>>) -> (i32, i32) {
    %c0_i32 = arith.constant 0 : i32
    %c0_i32_0 = arith.constant 0 : i32
    return %arg0, %c0_i32 : i32, i32
  }
  func.func @transform_3(%arg0: i32, %arg1: memref<16xi32, #tpu.memory_space<smem>>) -> (i32, i32) {
    %c0_i32 = arith.constant 0 : i32
    %c0_i32_0 = arith.constant 0 : i32
    return %arg0, %c0_i32 : i32, i32
  }
  func.func @transform_4(%arg0: i32, %arg1: memref<16xi32, #tpu.memory_space<smem>>) -> (i32, i32) {
    %c0_i32 = arith.constant 0 : i32
    %c0_i32_0 = arith.constant 0 : i32
    return %arg0, %c0_i32 : i32, i32
  }
}

</mosaic_0001>

<bundles_post_ra>
// kernel: tpu_custom_call.1
= control target key start
LH: loop header
LB: loop body
LE: loop exit
PB: predicated region body
PF: predicated region fallthrough
CT: control target
= control target key end

     0   :  { %s932_s0 = inlined_call_operand.vmem [shape: s32[16], index: 0, kind: input, shape index: {}]   ;;  %s933_s1 = inlined_call_operand.vmem [shape: f32[16,16], index: 1, kind: input, shape index: {}]   ;;  %s934_s2 = inlined_call_operand.vmem [shape: f32[16,16], index: 2, kind: input, shape index: {}]   ;;  %s935_s3 = inlined_call_operand.vmem [shape: f32[32,16], index: 3, kind: input, shape index: {}]   ;;  %s936_s4 = inlined_call_operand.hbm [shape: f32[16,128], index: 4, kind: output, shape index: {0}]   ;;  %s937_s5 = inlined_call_operand.hbm [shape: f32[16,16], index: 5, kind: output, shape index: {1}]  }
   0x1   :  { %s11_s20 = sshll.u32 %s932_s0, 4  ;;  %s12_s20 = int_to_ptr.vmem [resolvable:$true] %s11_s20 }
   0x2   :  { %s598_s21 = scalar_lea.vmem %s12_s20, 16  ;;  %p603_p1 = scmp.lt.s32.totalorder %s12_s20, %s12_s20 }
   0x3   :  { %p599_p0 = scmp.ne.s32.totalorder %s12_s20, %s598_s21  ;;  %p604_p2 = scmp.lt.s32.totalorder %s598_s21, %s598_s21 }
   0x5   :  { %p605_p3 = por %p604_p2, %p603_p1 }
   0x7   :  { %p606_p4 = pnand %p605_p3, %p599_p0 }
   0x9   :  { %609 = shalt.err (!%p606_p4)  }
   0xa   :  { %s726_s22 = smov [#allocation5]  }
   0xb   :  { %14 = dma.vmem_to_smem %s12_s20, 16, %s726_s22, [#allocation4] }
   0xc   :  { %690 = dma.done.wait [#allocation4], 16 }
   0xd   :  { %691 = vsyncadd [#allocation4], 4294967280 }
   0xe   :  { %16 = sfence }
   0xf   :  { %17 = vsyncpa [#allocation7], 0 }
  0x10   :  { %19 = vsyncpa [#allocation7 + $0x1], 0 }
  0x11   :  { %20 = vsyncpa [#allocation9], 0 }
  0x12   :  { %22 = vsyncpa [#allocation9 + $0x1], 0  ;;  %s762_s23 = smov 0   ;;  %s764_s0 = smov 0  }
  0x13   :  { %s766_s24 = smov 0   ;;  %s768_s25 = smov 0  }
  0x14 LB: > { %s783_s26 = sadd.s32 4294967295, %s716_s25   ;;  %s503_s27 = sadd.s32 4294967294, %s716_s25   ;;  %s716_s25 = sphi %s768_s25, %s943_s25   ;;  %s712_s24 = sphi %s766_s24, %s942_s24   ;;  %s708_s0 = sphi %s764_s0, %s941_s0   ;;  %s704_s23 = sphi %s762_s23, %s940_s23  }
  0x15   : > { %s787_s28 = sadd.s32 1, %s716_s25   ;;  %s87_s29 = sadd.s32 1, %s712_s24 }
  0x16   : > { %s84_s30 = ssub.s32 %s716_s25, %s787_s28  ;;  %p97_p5 = scmp.ne.s32.totalorder %s712_s24, %s708_s0 }
  0x17   : > { %p85_p6 = scmp.eq.s32.totalorder %s84_s30, 0  ;;  %p98_p7 = scmp.eq.s32.totalorder %s783_s26, 1 }
  0x18   : > { %p103_p8 = scmp.ne.s32.totalorder %s708_s0, %s704_s23  ;;  %p104_p9 = scmp.eq.s32.totalorder %s503_s27, 1 }
  0x19   : > { %s798_s6 = scalar_select %p85_p6, %s712_s24, %s87_s29  }
  0x1a   : > { %p800_p10 = por %p98_p7, %p97_p5  ;;  %p804_p11 = por %p104_p9, %p103_p8 }
  0x1b   : > { %p506_p12 = scmp.ge.s32.totalorder %s716_s25, 1  ;;  %p162_p13 = scmp.lt.s32.totalorder %s716_s25, 3 }
  0x1d   : > { %p163_p0 = pnand %p506_p12, %p162_p13 }
  0x1e   : > { %s811_s9 = sand.u32 (!%p163_p0), 1, %s708_s0   ;;  %p194_p1 = scmp.lt.s32.totalorder (!%p163_p0), %s783_s26, 1 }
  0x1f   : > { %166 = sbr.rel (%p163_p0) target bundleno = 593 (0x251), region = 28  ;;  %s507_s10 = sshll.u32 (!%p163_p0), %s811_s9, 3 }
  0x20   : > { %s822_s19 = scalar_lea.vmem (!%p163_p0), [#allocation6], %s507_s10  ;;  %s824_s20 = scalar_lea.vmem (!%p163_p0), [#allocation8], %s507_s10 }
  0x21   : > { %s718_s21 = smov (!%p163_p0), 0  }
  0x26   : > { %s195_s11 = scalar_select %p194_p1, %s783_s26, 1 }
  0x28   : > { %s509_s12 = sshll.u32 %s195_s11, 3 }
  0x29   : > { %s197_s15 = scalar_lea.vmem %s933_s1, %s509_s12  ;;  %s201_s18 = scalar_lea.vmem %s934_s2, %s509_s12 }
  0x2a LB: >> { %s511_s22 = sshll.u32 %s783_s26, 3  ;;  %s212_s14 = scalar_lea.vmem [#allocation2], %s720_s21  ;;  %s720_s21 = sphi %s718_s21, %s207_s21  }
  0x2b   : >> { %s209_s27 = sadd.s32 %s720_s21, %s511_s22 }
  0x2c   : >> { %s210_s29 = sld [smem:[#allocation5 + %s209_s27]] }
  0x32   : >> { %s211_s13 = scalar_lea.vmem %s935_s3, %s210_s29 }
  0x33   : >> { %v230_v0 = vld [vmem:[%s211_s13] sm:$0x1] }
  0x34   : >> { %231 = vst [vmem:[%s212_s14] sm:$0x1] %v230_v0 }
  0x35   : >> { %256 = vsyncadd [#allocation3], 16  ;;  %s207_s21 = sadd.s32 1, %s720_s21  }
  0x36   : >> { %p204_p2 = scmp.ge.s32.totalorder %s207_s21, 8  }
  0x37   : > { %v257_v1 = vld [vmem:[%s197_s15] sm:$0xff] (%p204_p2)  ;;  %vm258_vm0 = vcmask (%p204_p2), 130048   ;;  %s722_s10 = smov (%p204_p2), 0  }
  0x38   : > { %206 = sbr.rel (!%p204_p2) target bundleno = 42 (0x2a), region = 139  ;;  %v273_v2 = vld [vmem:[%s201_s18] sm:$0xff] (%p204_p2)  ;;  %v259_v3 = vsel (%p204_p2), %vm258_vm0, %v257_v1, -inf }
  0x39   : > { %260 = vmax.xlane.f32.xlu0 (%p204_p2), %v259_v3  ;;  %v274_v4 = vsel (%p204_p2), %vm258_vm0, %v273_v2, -inf }
  0x3d   : > { %275 = vmax.xlane.f32.xlu0 (%p204_p2), %v274_v4 }
  0xc6   : > { %v261_v5 = vpop.xlane.xlu0 %260 }
  0xc7   : > { %v832_v6 = vsub.f32 %v257_v1, %v261_v5 }
  0xc9   : > { %v263_v7 = vmul.f32 1.442695, %v832_v6 }
  0xca   : > { %v276_v8 = vpop.xlane.xlu0 %275 }
  0xcb   : > { %580 = vpow2.f32 %v263_v7  ;;  %v835_v9 = vsub.f32 %v273_v2, %v276_v8 }
  0xcd   : > { %v278_v10 = vmul.f32 1.442695, %v835_v9 }
  0xcf   : > { %582 = vpow2.f32 %v278_v10 }
  0xd5   : > { %v581_v11 = vpop.eup %580 }
  0xd6   : > { %v265_v12 = vsel %vm258_vm0, %v581_v11, 0.0 }
  0xd7   : > { %266 = vadd.xlane.f32.xlu1 %v265_v12 }
  0xd9   : > { %v583_v13 = vpop.eup %582 }
  0xda   : > { %v280_v14 = vsel %vm258_vm0, %v583_v13, 0.0 }
  0xdb   : > { %281 = vadd.xlane.f32.xlu1 %v280_v14 }
 0x164   : > { %v267_v15 = vpop.xlane.xlu1 %266 }
 0x165   : > { %584 = vrcp.f32 %v267_v15 }
 0x166   : > { %586 = vlog2.f32 %v267_v15 }
 0x168   : > { %v282_v16 = vpop.xlane.xlu1 %281 }
 0x169   : > { %588 = vrcp.f32 %v282_v16 }
 0x16a   : > { %590 = vlog2.f32 %v282_v16 }
 0x16f   : > { %v585_v17 = vpop.eup %584 }
 0x170   : > { %v587_v18 = vpop.eup %586  ;;  %v269_v19 = vmul.f32 %v585_v17, %v581_v11 }
 0x171   : > { %v271_v20 = vmul.f32 0.6931472, %v587_v18 }
 0x173   : > { %v589_v21 = vpop.eup %588  ;;  %v272_v22 = vsub.f32 %v832_v6, %v271_v20 }
 0x174   : > { %v591_v23 = vpop.eup %590  ;;  %v284_v24 = vmul.f32 %v589_v21, %v583_v13 }
 0x175   : > { %v286_v25 = vmul.f32 0.6931472, %v591_v23 }
 0x177   : > { %v287_v26 = vsub.f32 %v835_v9, %v286_v25 }
 0x178 LB: >> { %692 = dma.done.wait [#allocation3], 16  ;;  %s724_s10 = sphi %s722_s10, %s293_s10  }
 0x179   : >> { %693 = vsyncadd [#allocation3], 4294967280  ;;  %s293_s10 = sadd.s32 1, %s724_s10  }
 0x17a   : >> { %p290_p3 = scmp.ge.s32.totalorder %s293_s10, 8  }
 0x17b   : > { %v298_v27 = vsub.f32 (%p290_p3), 1.0, %v269_v19  ;;  %v301_v28 = vsub.f32 (%p290_p3), 1.0, %v284_v24  ;;  %v324_v29 = vmul.f32 (%p290_p3), %v284_v24, %v269_v19  ;;  %v296_v30 = vld [vmem:[#allocation2] sm:$0xff] (%p290_p3)  ;;  %s514_s12 = sshll.u32 (%p290_p3), %s783_s26, 7  ;;  %s372_s15 = sshll.u32 (%p290_p3), %s824_s20, 4  ;;  %s856_s15 = int_to_ptr.vmem [resolvable:$true] %s372_s15 }
 0x17c   : > { %292 = sbr.rel (!%p290_p3) target bundleno = 376 (0x178), region = 150  ;;  %vm297_vm1 = vcmp.gt.f32.partialorder (%p290_p3), %v296_v30, 0.0  ;;  %s854_s18 = scalar_lea.hbm (%p290_p3), %s937_s5, %s514_s12 }
 0x17d   : > { %v299_v31 = vand.u32 (%p290_p3), 2147483647, %v298_v27  ;;  %v302_v32 = vand.u32 (%p290_p3), 2147483647, %v301_v28  ;;  %592 = vrsqrt.f32 (%p290_p3), %v324_v29  ;;  %vm327_vm2 = vcmp.eq.f32.partialorder (%p290_p3), %v324_v29, inf  ;;  %s346_s21 = scalar_lea.sflag (%p290_p3), [#allocation9], %s811_s9 }
 0x17e   : > { %v330_v38 = vand.u32 (%p290_p3), 2147483648, %v324_v29  ;;  %vm329_vm3 = vcmp.eq.f32.partialorder (%p290_p3), %v324_v29, 0.0  ;;  %s610_s22 = scalar_lea.vmem (%p290_p3), %s856_s15, 128  ;;  %s727_s27 = smov (%p290_p3), [#allocation8]  }
 0x17f   : > { %v300_v33 = vadd.f32 (%p290_p3), 1e-09, %v299_v31  ;;  %v303_v34 = vadd.f32 (%p290_p3), 1e-09, %v302_v32  ;;  %p611_p4 = scmp.ne.s32.totalorder (%p290_p3), %s856_s15, %s610_s22  ;;  %s614_s29 = sshll.u32 (%p290_p3), %s727_s27, 4  ;;  %s615_s29 = int_to_ptr.vmem [resolvable:$false] %s614_s29 }
 0x180   : > { %s616_s30 = scalar_lea.vmem (%p290_p3), %s615_s29, 256  ;;  %p617_p7 = scmp.lt.s32.totalorder (%p290_p3), %s856_s15, %s615_s29 }
 0x181   : > { %v304_v35 = vmul.f32 (%p290_p3), %v303_v34, %v300_v33  ;;  %p612_p5 = pnand (%p290_p3), %p611_p4, %p800_p10  ;;  %p618_p8 = scmp.lt.s32.totalorder (%p290_p3), %s616_s30, %s610_s22 }
 0x183   : > { %v305_v36 = vsel %vm297_vm1, %v296_v30, %v304_v35  ;;  %p613_p6 = pneg %p612_p5  ;;  %p619_p9 = por %p618_p8, %p617_p7 }
 0x184   : > { %594 = vlog2.f32 %v305_v36 }
 0x185   : > { %p620_p12 = pnand %p619_p9, %p613_p6 }
 0x187   : > { %v593_v37 = vpop.eup %592 }
 0x188   : > { %v326_v39 = vmul.f32 %v593_v37, %v324_v29 }
 0x18a   : > { %v328_v40 = vsel %vm327_vm2, %v324_v29, %v326_v39 }
 0x18b   : > { %v331_v41 = vsel %vm329_vm3, %v330_v38, %v328_v40 }
 0x18c   : > { %v332_v42 = vsel %vm297_vm1, %v331_v41, 0.0 }
 0x18d   : > { %v333_v43 = vsel %vm258_vm0, %v332_v42, 0.0 }
 0x18e   : > { %v595_v44 = vpop.eup %594  ;;  %334 = vadd.xlane.f32.xlu0 %v333_v43 }
 0x18f   : > { %v307_v45 = vmul.f32 0.6931472, %v595_v44 }
 0x191   : > { %v308_v46 = vmul.f32 2.0, %v307_v45  ;;  %v312_v49 = vsub.f32 0.0, %v307_v45 }
 0x193   : > { %v309_v47 = vsub.f32 %v308_v46, %v272_v22 }
 0x195   : > { %v310_v48 = vsub.f32 %v309_v47, %v287_v26 }
 0x197   : > { %v311_v50 = vmul.f32 %v310_v48, %v296_v30 }
 0x199   : > { %v313_v51 = vsel %vm297_vm1, %v311_v50, %v312_v49 }
 0x19a   : > { %v314_v52 = vsel %vm258_vm0, %v313_v51, 0.0 }
 0x19b   : > { %315 = vadd.xlane.f32.xlu0 %v314_v52 }
 0x21b   : > { %v335_v53 = vpop.xlane.xlu0 %334 }
 0x21c   : > { %v336_v54 = vadd.f32 1e-09, %v335_v53 }
 0x21e   : > { %596 = vrcp.f32 %v336_v54 }
 0x228   : > { %v597_v55 = vpop.eup %596  ;;  %v316_v56 = vpop.xlane.xlu0 %315 }
 0x229   : > { %v317_v57 = vrot.slane %v316_v56, 4  ;;  %v338_v58 = vmul.f32 %v597_v55, %v332_v42 }
 0x22b   : > { %v318_v59 = vadd.f32 %v317_v57, %v316_v56  ;;  %339 = vst.msk [vmem:[%s824_s20] sm:$0xff] %vm258_vm0, %v338_v58 }
 0x22c   : > { %623 = shalt.err (!%p620_p12)
}
 0x22d   : > { %s624_s20 = scalar_lea.hbm %s854_s18, 128  ;;  %s628_s14 = scalar_lea.hbm %s937_s5, 256 }
 0x22e   : > { %p625_p13 = scmp.ne.s32.totalorder %s854_s18, %s624_s20  ;;  %p629_p2 = scmp.lt.u32.totalorder %s854_s18, %s937_s5 }
 0x22f   : > { %p630_p3 = scmp.lt.u32.totalorder %s628_s14, %s624_s20  ;;  %p632_p5 = scmp.lt.u32.totalorder %s624_s20, %s854_s18 }
 0x230   : > { %p626_p0 = pnand %p625_p13, %p800_p10 }
 0x231   : > { %p631_p4 = por %p630_p3, %p629_p2 }
 0x232   : > { %p627_p1 = pneg %p626_p0 }
 0x233   : > { %p633_p6 = por %p632_p5, %p631_p4 }
 0x235   : > { %p634_p7 = pnand %p633_p6, %p627_p1 }
 0x237   : > { %637 = shalt.err (!%p634_p7)
}
 0x238   : > { %520 = dma.vmem_to_hbm [thread:$0]  (%p800_p10), %s856_s15, 128, %s854_s18, %s346_s21   ;;  %v319_v60 = vrot.slane %v318_v59, 2 }
 0x239   : > { %s359_s17 = sshll.u32 %s822_s19, 4  ;;  %s888_s29 = scalar_lea.hbm %s936_s4, %s514_s12  ;;  %s890_s17 = int_to_ptr.vmem [resolvable:$true] %s359_s17 }
 0x23a   : > { %v320_v61 = vadd.f32 %v319_v60, %v318_v59  ;;  %s341_s30 = scalar_lea.sflag [#allocation7], %s811_s9  ;;  %s638_s20 = scalar_lea.vmem %s890_s17, 128 }
 0x23b   : > { %p639_p8 = scmp.ne.s32.totalorder %s890_s17, %s638_s20  ;;  %s728_s15 = smov [#allocation6]  }
 0x23c   : > { %v321_v62 = vrot.slane %v320_v61, 1  ;;  %s642_s18 = sshll.u32 %s728_s15, 4  ;;  %s643_s18 = int_to_ptr.vmem [resolvable:$false] %s642_s18 }
 0x23d   : > { %p640_p9 = pnand %p639_p8, %p800_p10  ;;  %s644_s26 = scalar_lea.vmem %s643_s18, 256 }
 0x23e   : > { %v322_v63 = vadd.f32 %v321_v62, %v320_v61  ;;  %p645_p13 = scmp.lt.s32.totalorder %s890_s17, %s643_s18  ;;  %p646_p0 = scmp.lt.s32.totalorder %s644_s26, %s638_s20 }
 0x23f   : > { %p641_p12 = pneg %p640_p9 }
 0x240   : > { %323 = vst [vmem:[%s822_s19] sm:$0xff] %v322_v63  ;;  %p647_p1 = por %p646_p0, %p645_p13 }
 0x242   : > { %p648_p2 = pnand %p647_p1, %p641_p12 }
 0x244   : > { %651 = shalt.err (!%p648_p2)
}
 0x245   : > { %s652_s9 = scalar_lea.hbm %s888_s29, 128  ;;  %s656_s21 = scalar_lea.hbm %s936_s4, 256 }
 0x246   : > { %p653_p3 = scmp.ne.s32.totalorder %s888_s29, %s652_s9  ;;  %p657_p6 = scmp.lt.u32.totalorder %s888_s29, %s936_s4 }
 0x247   : > { %p658_p7 = scmp.lt.u32.totalorder %s656_s21, %s652_s9  ;;  %p660_p9 = scmp.lt.u32.totalorder %s652_s9, %s888_s29 }
 0x248   : > { %p654_p4 = pnand %p653_p3, %p800_p10 }
 0x249   : > { %p659_p8 = por %p658_p7, %p657_p6 }
 0x24a   : > { %p655_p5 = pneg %p654_p4 }
 0x24b   : > { %p661_p12 = por %p660_p9, %p659_p8 }
 0x24d   : > { %p662_p13 = pnand %p661_p12, %p655_p5 }
 0x24f   : > { %665 = shalt.err (!%p662_p13)
}
 0x250   : > { %519 = dma.vmem_to_hbm [thread:$0]  (%p800_p10), %s890_s17, 128, %s888_s29, %s341_s30  }
 0x251 PF: > { %p530_p0 = scmp.ge.s32.totalorder %s716_s25, 2  ;;  %s384_s14 = sand.u32 1, %s704_s23  }
 0x252   : > { %s385_s10 = scalar_lea.sflag [#allocation7], %s384_s14 }
 0x253   : > { %p524_p1 = pnand %p530_p0, %p804_p11 }
 0x255   : > { %695 = dma.done.wait (!%p524_p1), %s385_s10, 128  }
 0x256   : > { %697 = vsyncadd (!%p524_p1), %s385_s10, 4294967168  ;;  %s394_s16 = scalar_lea.sflag [#allocation9], %s384_s14 }
 0x257   : > { %699 = dma.done.wait (!%p524_p1), %s394_s16, 128  }
 0x258   : > { %701 = vsyncadd (!%p524_p1), %s394_s16, 4294967168  ;;  %p25_p10 = scmp.ge.s32.totalorder %s787_s28, 4   ;;  %s940_s23 = smov %s708_s0 }
 0x259   : > { %s941_s0 = smov %s712_s24  ;;  %s942_s24 = smov %s798_s6 }
 0x25a   : > { %s943_s25 = smov %s787_s28  ;;  %27 = sbr.rel (!%p25_p10) target bundleno = 20 (0x14), region = 161 }
 0x261   :  { %399 = vsyncpa [#allocation7], 1 }
 0x262   :  { %401 = vsyncpa [#allocation7 + $0x1], 1 }
 0x263   :  { %402 = vsyncpa [#allocation9], 1 }
 0x264   :  { %404 = vsyncpa [#allocation9 + $0x1], 1 }
 0x265   :  { %405 = vsyncmov [#allocation3] }
 0x268   :  { %s406_s25 = vpop.sfrf %405 }
 0x269   :  { %p518_p11 = scmp.ne.s32.totalorder %s406_s25, 0 }
 0x26b   :  { %410 = shalt.err (%p518_p11)  }

</bundles_post_ra>
